<compile_context>
chip_gen: v5e
topology: v5e:2x2
jax: 0.10.0
libtpu: 0.0.40
codegen_flags: <defaults>
</compile_context>

<pallas_src>
import functools

import jax
import jax.numpy as jnp
from jax.experimental import pallas as pl
from jax.experimental.pallas import tpu as pltpu

BN_EPS = 1e-5


def resblock_kernel(x_ref, bd1_ref, bd2_ref, pool_ref,
                    g1_ref, b1_ref, g2_ref, b2_ref, out_ref, *, H, W):
    """Whole ResBlock forward, fully resident in VMEM, lane-dense layout.

    x_ref   : (N*H, W*Cin)        input, (w, c) packed into the lane dim
    bd1_ref : (3, W*Cin,  W*Cout) block-banded conv1 weights (one per kh tap)
    bd2_ref : (3, W*Cout, W*Cout) block-banded conv2 weights
    pool_ref: (W*Cout, W*Cout)    0/1 matrix: sums lanes of equal channel and
                                  broadcasts the result back to those lanes
    g*/b*   : (1, W*Cout)         BN gamma/beta pre-tiled across the W groups
    out_ref : (N*H, W*Cout)       lane-dense output slab
    """
    M = x_ref.shape[0]                  # N*H rows
    inv_n = 1.0 / (M * W)               # 1 / (N*H*W) samples per channel

    # Row index within each image, for masking the kh = 0 / 2 taps at the
    # top / bottom image borders (rolls wrap across images; we zero those rows).
    row = jax.lax.broadcasted_iota(jnp.int32, (M, 1), 0) % H
    at_top = row == 0
    at_bot = row == (H - 1)

    def h_taps(a):
        # tap[kh] holds the rows needed for kernel row kh (i.e. x[i + kh - 1]).
        up = jnp.where(at_top, 0.0, pltpu.roll(a, shift=1, axis=0))
        dn = jnp.where(at_bot, 0.0, pltpu.roll(a, shift=M - 1, axis=0))
        return (up, a, dn)

    def conv3x3(a, band_ref):
        taps = h_taps(a)
        acc = jnp.zeros((M, band_ref.shape[-1]), jnp.float32)
        for kh in range(3):                       # 3 full-width MXU matmuls
            acc = acc + jnp.dot(taps[kh], band_ref[kh],
                                preferred_element_type=jnp.float32)
        return acc

    pool = pool_ref[...]

    def bn_relu(acc, gamma_w, beta_w):
        # Per-channel mean over (N, H, W), broadcast back to every lane of the
        # channel via the pooling matmul; centered (two-pass) variance.
        mu = jnp.sum(jnp.dot(acc, pool, preferred_element_type=jnp.float32),
                     axis=0, keepdims=True) * inv_n
        cen = acc - mu
        var = jnp.sum(jnp.dot(cen * cen, pool,
                              preferred_element_type=jnp.float32),
                      axis=0, keepdims=True) * inv_n
        scale = gamma_w * jax.lax.rsqrt(var + BN_EPS)
        return jnp.maximum(cen * scale + beta_w, 0.0)

    h1 = bn_relu(conv3x3(x_ref[...], bd1_ref), g1_ref[...], b1_ref[...])
    h2 = bn_relu(conv3x3(h1, bd2_ref), g2_ref[...], b2_ref[...])
    out_ref[...] = h2                    # lane-dense (N*H, W*Cout) store


def _band_weights(w_hwio, W):
    """Fold the kw shift + W zero-padding of a 3x3 'same' conv into a
    block-banded matrix per kh tap: (3, W*Cin, W*Cout)."""
    kh_dim, kw_dim, Ci, Co = w_hwio.shape
    wi = jnp.arange(W)[:, None]                 # input column
    wo = jnp.arange(W)[None, :]                 # output column
    kw = wi - wo + 1                            # kernel column feeding (wi->wo)
    valid = (kw >= 0) & (kw < kw_dim)
    kw_c = jnp.clip(kw, 0, kw_dim - 1)
    blocks = w_hwio[:, kw_c]                    # (3, W, W, Ci, Co)
    blocks = jnp.where(valid[None, :, :, None, None], blocks, 0.0)
    return blocks.transpose(0, 1, 3, 2, 4).reshape(kh_dim, W * Ci, W * Co)


def _channel_pool(W, C):
    """(W*C, W*C) 0/1 matrix: x @ pool sums lanes of the same channel and
    broadcasts the sum back to every lane of that channel."""
    lane = jnp.arange(W * C)
    return (lane[:, None] % C == lane[None, :] % C).astype(jnp.float32)


@jax.jit
def resblock_forward(x_nchw, w1, g1, b1, w2, g2, b2):
    """NCHW in / NCHW out wrapper around the Pallas kernel."""
    N, Cin, H, W = x_nchw.shape
    Cout = w1.shape[-1]
    WC = W * Cout

    # Lane-dense input: (N*H, W*Cin), element (w, c) at lane w*Cin + c.
    x_wide = jnp.transpose(x_nchw, (0, 2, 3, 1)).astype(jnp.float32)
    x_wide = x_wide.reshape(N * H, W * Cin)

    band1 = _band_weights(w1.astype(jnp.float32), W)     # (3, W*Cin, WC)
    band2 = _band_weights(w2.astype(jnp.float32), W)     # (3, WC, WC)
    pool = _channel_pool(W, Cout)                        # (WC, WC)

    g1w = jnp.tile(g1.reshape(1, Cout).astype(jnp.float32), (1, W))
    b1w = jnp.tile(b1.reshape(1, Cout).astype(jnp.float32), (1, W))
    g2w = jnp.tile(g2.reshape(1, Cout).astype(jnp.float32), (1, W))
    b2w = jnp.tile(b2.reshape(1, Cout).astype(jnp.float32), (1, W))

    out_wide = pl.pallas_call(
        functools.partial(resblock_kernel, H=H, W=W),
        out_shape=jax.ShapeDtypeStruct((N * H, WC), jnp.float32),
        in_specs=[pl.BlockSpec(memory_space=pltpu.MemorySpace.VMEM)] * 8,
        out_specs=pl.BlockSpec(memory_space=pltpu.MemorySpace.VMEM),
    )(x_wide, band1, band2, pool, g1w, b1w, g2w, b2w)

    out_nhwc = out_wide.reshape(N, H, W, Cout)
    return jnp.transpose(out_nhwc, (0, 3, 1, 2))


def resblock_reference(x_nchw, w1, g1, b1, w2, g2, b2):
    """Pure-JAX reference (same math as the PyTorch module in train mode)."""
    x = jnp.transpose(x_nchw, (0, 2, 3, 1)).astype(jnp.float32)

    def conv(h, w):
        return jax.lax.conv_general_dilated(
            h, w, window_strides=(1, 1), padding="SAME",
            dimension_numbers=("NHWC", "HWIO", "NHWC"),
            precision=jax.lax.Precision.HIGHEST)

    def bn_relu(h, g, b):
        mu = jnp.mean(h, axis=(0, 1, 2), keepdims=True)
        var = jnp.mean(jnp.square(h - mu), axis=(0, 1, 2), keepdims=True)
        hn = (h - mu) * jax.lax.rsqrt(var + BN_EPS) * g + b
        return jnp.maximum(hn, 0.0)

    h = bn_relu(conv(x, w1), g1, b1)
    h = bn_relu(conv(h, w2), g2, b2)
    return jnp.transpose(h, (0, 3, 1, 2))


if __name__ == "__main__":
    N, IN_CH, OUT_CH, H, W = 2, 4, 8, 16, 16

    key = jax.random.PRNGKey(0)
    kx, kw1, kw2 = jax.random.split(key, 3)

    x = jax.random.normal(kx, (N, IN_CH, H, W), dtype=jnp.float32)

    # Deterministic parameter init (synthetic; shapes follow nn.Conv2d/BatchNorm2d).
    # Conv weights stored HWIO = (3, 3, Cin, Cout).
    w1 = 0.1 * jax.random.normal(kw1, (3, 3, IN_CH, OUT_CH), dtype=jnp.float32)
    w2 = 0.1 * jax.random.normal(kw2, (3, 3, OUT_CH, OUT_CH), dtype=jnp.float32)
    g1 = 1.0 + 0.1 * jnp.arange(OUT_CH, dtype=jnp.float32)
    b1 = 0.01 * jnp.arange(OUT_CH, dtype=jnp.float32)
    g2 = 1.0 - 0.05 * jnp.arange(OUT_CH, dtype=jnp.float32)
    b2 = -0.02 * jnp.arange(OUT_CH, dtype=jnp.float32)

    out = resblock_forward(x, w1, g1, b1, w2, g2, b2)
    out = jax.block_until_ready(out)

    ref = resblock_reference(x, w1, g1, b1, w2, g2, b2)
    assert out.shape == (N, OUT_CH, H, W)
    assert jnp.allclose(out, ref, atol=1e-2, rtol=1e-2)

    print("KERNEL_OK")
</pallas_src>

<mosaic_0001>
module attributes {stable_mosaic.version = 11 : i64} {
  func.func @resblock_kernel(%arg0: memref<32x64xf32, #tpu.memory_space<vmem>>, %arg1: memref<3x64x128xf32, #tpu.memory_space<vmem>>, %arg2: memref<3x128x128xf32, #tpu.memory_space<vmem>>, %arg3: memref<128x128xf32, #tpu.memory_space<vmem>>, %arg4: memref<1x128xf32, #tpu.memory_space<vmem>>, %arg5: memref<1x128xf32, #tpu.memory_space<vmem>>, %arg6: memref<1x128xf32, #tpu.memory_space<vmem>>, %arg7: memref<1x128xf32, #tpu.memory_space<vmem>>, %arg8: memref<32x128xf32, #tpu.memory_space<vmem>>) attributes {dimension_semantics = [], scalar_prefetch = 0 : i64, scratch_operands = 0 : i64, tpu.core_type = #tpu.core_type<tc>} {
    %0 = tpu.iota {dimensions = array<i32: 0>} : vector<32x1xi32>
    %c16_i32 = arith.constant 16 : i32
    %c0_i32 = arith.constant 0 : i32
    %1 = arith.cmpi eq, %c16_i32, %c0_i32 : i32
    %c1_i32 = arith.constant 1 : i32
    %2 = arith.select %1, %c1_i32, %c16_i32 : i32
    %3 = vector.broadcast %2 : i32 to vector<32x1xi32>
    %4 = arith.remsi %0, %3 : vector<32x1xi32>
    %c0_i32_0 = arith.constant 0 : i32
    %5 = vector.broadcast %c0_i32_0 : i32 to vector<32x1xi32>
    %6 = arith.cmpi ne, %4, %5 : vector<32x1xi32>
    %c0_i32_1 = arith.constant 0 : i32
    %7 = vector.broadcast %c0_i32_1 : i32 to vector<32x1xi32>
    %8 = arith.cmpi slt, %4, %7 : vector<32x1xi32>
    %c0_i32_2 = arith.constant 0 : i32
    %9 = arith.cmpi slt, %2, %c0_i32_2 : i32
    %10 = vector.broadcast %9 : i1 to vector<32x1xi1>
    %11 = vector.broadcast %10 : vector<32x1xi1> to vector<32x1xi1>
    %12 = arith.xori %8, %11 : vector<32x1xi1>
    %13 = arith.andi %12, %6 : vector<32x1xi1>
    %14 = vector.broadcast %2 : i32 to vector<32x1xi32>
    %15 = arith.addi %4, %14 : vector<32x1xi32>
    %16 = arith.select %13, %15, %4 : vector<32x1xi1>, vector<32x1xi32>
    %c0_i32_3 = arith.constant 0 : i32
    %17 = vector.broadcast %c0_i32_3 : i32 to vector<32x1xi32>
    %18 = arith.cmpi eq, %16, %17 : vector<32x1xi32>
    %c15_i32 = arith.constant 15 : i32
    %19 = vector.broadcast %c15_i32 : i32 to vector<32x1xi32>
    %20 = arith.cmpi eq, %16, %19 : vector<32x1xi32>
    %c0 = arith.constant 0 : index
    %c0_4 = arith.constant 0 : index
    %21 = vector.load %arg3[%c0, %c0_4] : memref<128x128xf32, #tpu.memory_space<vmem>>, vector<128x128xf32>
    %c0_5 = arith.constant 0 : index
    %c0_6 = arith.constant 0 : index
    %22 = vector.load %arg0[%c0_5, %c0_6] : memref<32x64xf32, #tpu.memory_space<vmem>>, vector<32x64xf32>
    %c1_i32_7 = arith.constant 1 : i32
    %23 = tpu.dynamic_rotate %22 by %c1_i32_7 dim 0 : vector<32x64xf32>, i32 -> vector<32x64xf32>
    %cst = arith.constant 0.000000e+00 : f32
    %24 = vector.shape_cast %18 : vector<32x1xi1> to vector<32x1xi1>
    %25 = vector.broadcast %24 : vector<32x1xi1> to vector<32x64xi1>
    %26 = vector.broadcast %cst : f32 to vector<32x64xf32>
    %27 = arith.select %25, %26, %23 : vector<32x64xi1>, vector<32x64xf32>
    %c31_i32 = arith.constant 31 : i32
    %28 = tpu.dynamic_rotate %22 by %c31_i32 dim 0 : vector<32x64xf32>, i32 -> vector<32x64xf32>
    %cst_8 = arith.constant 0.000000e+00 : f32
    %29 = vector.shape_cast %20 : vector<32x1xi1> to vector<32x1xi1>
    %30 = vector.broadcast %29 : vector<32x1xi1> to vector<32x64xi1>
    %31 = vector.broadcast %cst_8 : f32 to vector<32x64xf32>
    %32 = arith.select %30, %31, %28 : vector<32x64xi1>, vector<32x64xf32>
    %cst_9 = arith.constant 0.000000e+00 : f32
    %33 = vector.broadcast %cst_9 : f32 to vector<32x128xf32>
    %c0_10 = arith.constant 0 : index
    %c0_11 = arith.constant 0 : index
    %c0_12 = arith.constant 0 : index
    %34 = vector.load %arg1[%c0_10, %c0_11, %c0_12] : memref<3x64x128xf32, #tpu.memory_space<vmem>>, vector<1x64x128xf32>
    %35 = vector.shape_cast %34 : vector<1x64x128xf32> to vector<64x128xf32>
    %cst_13 = arith.constant dense<0.000000e+00> : vector<32x128xf32>
    %36 = tpu.matmul %27, %35, %cst_13 {dimension_numbers = #tpu.dot_dimension_numbers<[1], [0], [0], [1], [0, 0, 1, 1], [], []>} : vector<32x64xf32>, vector<64x128xf32>, vector<32x128xf32> -> vector<32x128xf32>
    %37 = arith.addf %33, %36 : vector<32x128xf32>
    %c1 = arith.constant 1 : index
    %c0_14 = arith.constant 0 : index
    %c0_15 = arith.constant 0 : index
    %38 = vector.load %arg1[%c1, %c0_14, %c0_15] : memref<3x64x128xf32, #tpu.memory_space<vmem>>, vector<1x64x128xf32>
    %39 = vector.shape_cast %38 : vector<1x64x128xf32> to vector<64x128xf32>
    %cst_16 = arith.constant dense<0.000000e+00> : vector<32x128xf32>
    %40 = tpu.matmul %22, %39, %cst_16 {dimension_numbers = #tpu.dot_dimension_numbers<[1], [0], [0], [1], [0, 0, 1, 1], [], []>} : vector<32x64xf32>, vector<64x128xf32>, vector<32x128xf32> -> vector<32x128xf32>
    %41 = arith.addf %37, %40 : vector<32x128xf32>
    %c2 = arith.constant 2 : index
    %c0_17 = arith.constant 0 : index
    %c0_18 = arith.constant 0 : index
    %42 = vector.load %arg1[%c2, %c0_17, %c0_18] : memref<3x64x128xf32, #tpu.memory_space<vmem>>, vector<1x64x128xf32>
    %43 = vector.shape_cast %42 : vector<1x64x128xf32> to vector<64x128xf32>
    %cst_19 = arith.constant dense<0.000000e+00> : vector<32x128xf32>
    %44 = tpu.matmul %32, %43, %cst_19 {dimension_numbers = #tpu.dot_dimension_numbers<[1], [0], [0], [1], [0, 0, 1, 1], [], []>} : vector<32x64xf32>, vector<64x128xf32>, vector<32x128xf32> -> vector<32x128xf32>
    %45 = arith.addf %41, %44 : vector<32x128xf32>
    %c0_20 = arith.constant 0 : index
    %c0_21 = arith.constant 0 : index
    %46 = vector.load %arg4[%c0_20, %c0_21] : memref<1x128xf32, #tpu.memory_space<vmem>>, vector<1x128xf32>
    %c0_22 = arith.constant 0 : index
    %c0_23 = arith.constant 0 : index
    %47 = vector.load %arg5[%c0_22, %c0_23] : memref<1x128xf32, #tpu.memory_space<vmem>>, vector<1x128xf32>
    %cst_24 = arith.constant dense<0.000000e+00> : vector<32x128xf32>
    %48 = tpu.matmul %45, %21, %cst_24 {dimension_numbers = #tpu.dot_dimension_numbers<[1], [0], [0], [1], [0, 0, 1, 1], [], []>} : vector<32x128xf32>, vector<128x128xf32>, vector<32x128xf32> -> vector<32x128xf32>
    %cst_25 = arith.constant dense<0.000000e+00> : vector<128xf32>
    %49 = vector.multi_reduction <add>, %48, %cst_25 [0] : vector<32x128xf32> to vector<128xf32>
    %50 = vector.shape_cast %49 : vector<128xf32> to vector<1x128xf32>
    %cst_26 = arith.constant 0.001953125 : f32
    %51 = vector.broadcast %cst_26 : f32 to vector<1x128xf32>
    %52 = arith.mulf %50, %51 : vector<1x128xf32>
    %53 = vector.broadcast %52 : vector<1x128xf32> to vector<32x128xf32>
    %54 = arith.subf %45, %53 : vector<32x128xf32>
    %55 = arith.mulf %54, %54 : vector<32x128xf32>
    %cst_27 = arith.constant dense<0.000000e+00> : vector<32x128xf32>
    %56 = tpu.matmul %55, %21, %cst_27 {dimension_numbers = #tpu.dot_dimension_numbers<[1], [0], [0], [1], [0, 0, 1, 1], [], []>} : vector<32x128xf32>, vector<128x128xf32>, vector<32x128xf32> -> vector<32x128xf32>
    %cst_28 = arith.constant dense<0.000000e+00> : vector<128xf32>
    %57 = vector.multi_reduction <add>, %56, %cst_28 [0] : vector<32x128xf32> to vector<128xf32>
    %58 = vector.shape_cast %57 : vector<128xf32> to vector<1x128xf32>
    %cst_29 = arith.constant 0.001953125 : f32
    %59 = vector.broadcast %cst_29 : f32 to vector<1x128xf32>
    %60 = arith.mulf %58, %59 : vector<1x128xf32>
    %cst_30 = arith.constant 9.99999974E-6 : f32
    %61 = vector.broadcast %cst_30 : f32 to vector<1x128xf32>
    %62 = arith.addf %60, %61 : vector<1x128xf32>
    %63 = math.rsqrt %62 : vector<1x128xf32>
    %64 = arith.mulf %46, %63 : vector<1x128xf32>
    %65 = vector.broadcast %64 : vector<1x128xf32> to vector<32x128xf32>
    %66 = arith.mulf %54, %65 : vector<32x128xf32>
    %67 = vector.broadcast %47 : vector<1x128xf32> to vector<32x128xf32>
    %68 = arith.addf %66, %67 : vector<32x128xf32>
    %cst_31 = arith.constant 0.000000e+00 : f32
    %69 = vector.broadcast %cst_31 : f32 to vector<32x128xf32>
    %70 = arith.maximumf %68, %69 : vector<32x128xf32>
    %c1_i32_32 = arith.constant 1 : i32
    %71 = tpu.dynamic_rotate %70 by %c1_i32_32 dim 0 : vector<32x128xf32>, i32 -> vector<32x128xf32>
    %cst_33 = arith.constant 0.000000e+00 : f32
    %72 = vector.shape_cast %18 : vector<32x1xi1> to vector<32x1xi1>
    %73 = vector.broadcast %72 : vector<32x1xi1> to vector<32x128xi1>
    %74 = vector.broadcast %cst_33 : f32 to vector<32x128xf32>
    %75 = arith.select %73, %74, %71 : vector<32x128xi1>, vector<32x128xf32>
    %c31_i32_34 = arith.constant 31 : i32
    %76 = tpu.dynamic_rotate %70 by %c31_i32_34 dim 0 : vector<32x128xf32>, i32 -> vector<32x128xf32>
    %cst_35 = arith.constant 0.000000e+00 : f32
    %77 = vector.shape_cast %20 : vector<32x1xi1> to vector<32x1xi1>
    %78 = vector.broadcast %77 : vector<32x1xi1> to vector<32x128xi1>
    %79 = vector.broadcast %cst_35 : f32 to vector<32x128xf32>
    %80 = arith.select %78, %79, %76 : vector<32x128xi1>, vector<32x128xf32>
    %cst_36 = arith.constant 0.000000e+00 : f32
    %81 = vector.broadcast %cst_36 : f32 to vector<32x128xf32>
    %c0_37 = arith.constant 0 : index
    %c0_38 = arith.constant 0 : index
    %c0_39 = arith.constant 0 : index
    %82 = vector.load %arg2[%c0_37, %c0_38, %c0_39] : memref<3x128x128xf32, #tpu.memory_space<vmem>>, vector<1x128x128xf32>
    %83 = vector.shape_cast %82 : vector<1x128x128xf32> to vector<128x128xf32>
    %cst_40 = arith.constant dense<0.000000e+00> : vector<32x128xf32>
    %84 = tpu.matmul %75, %83, %cst_40 {dimension_numbers = #tpu.dot_dimension_numbers<[1], [0], [0], [1], [0, 0, 1, 1], [], []>} : vector<32x128xf32>, vector<128x128xf32>, vector<32x128xf32> -> vector<32x128xf32>
    %85 = arith.addf %81, %84 : vector<32x128xf32>
    %c1_41 = arith.constant 1 : index
    %c0_42 = arith.constant 0 : index
    %c0_43 = arith.constant 0 : index
    %86 = vector.load %arg2[%c1_41, %c0_42, %c0_43] : memref<3x128x128xf32, #tpu.memory_space<vmem>>, vector<1x128x128xf32>
    %87 = vector.shape_cast %86 : vector<1x128x128xf32> to vector<128x128xf32>
    %cst_44 = arith.constant dense<0.000000e+00> : vector<32x128xf32>
    %88 = tpu.matmul %70, %87, %cst_44 {dimension_numbers = #tpu.dot_dimension_numbers<[1], [0], [0], [1], [0, 0, 1, 1], [], []>} : vector<32x128xf32>, vector<128x128xf32>, vector<32x128xf32> -> vector<32x128xf32>
    %89 = arith.addf %85, %88 : vector<32x128xf32>
    %c2_45 = arith.constant 2 : index
    %c0_46 = arith.constant 0 : index
    %c0_47 = arith.constant 0 : index
    %90 = vector.load %arg2[%c2_45, %c0_46, %c0_47] : memref<3x128x128xf32, #tpu.memory_space<vmem>>, vector<1x128x128xf32>
    %91 = vector.shape_cast %90 : vector<1x128x128xf32> to vector<128x128xf32>
    %cst_48 = arith.constant dense<0.000000e+00> : vector<32x128xf32>
    %92 = tpu.matmul %80, %91, %cst_48 {dimension_numbers = #tpu.dot_dimension_numbers<[1], [0], [0], [1], [0, 0, 1, 1], [], []>} : vector<32x128xf32>, vector<128x128xf32>, vector<32x128xf32> -> vector<32x128xf32>
    %93 = arith.addf %89, %92 : vector<32x128xf32>
    %c0_49 = arith.constant 0 : index
    %c0_50 = arith.constant 0 : index
    %94 = vector.load %arg6[%c0_49, %c0_50] : memref<1x128xf32, #tpu.memory_space<vmem>>, vector<1x128xf32>
    %c0_51 = arith.constant 0 : index
    %c0_52 = arith.constant 0 : index
    %95 = vector.load %arg7[%c0_51, %c0_52] : memref<1x128xf32, #tpu.memory_space<vmem>>, vector<1x128xf32>
    %cst_53 = arith.constant dense<0.000000e+00> : vector<32x128xf32>
    %96 = tpu.matmul %93, %21, %cst_53 {dimension_numbers = #tpu.dot_dimension_numbers<[1], [0], [0], [1], [0, 0, 1, 1], [], []>} : vector<32x128xf32>, vector<128x128xf32>, vector<32x128xf32> -> vector<32x128xf32>
    %cst_54 = arith.constant dense<0.000000e+00> : vector<128xf32>
    %97 = vector.multi_reduction <add>, %96, %cst_54 [0] : vector<32x128xf32> to vector<128xf32>
    %98 = vector.shape_cast %97 : vector<128xf32> to vector<1x128xf32>
    %cst_55 = arith.constant 0.001953125 : f32
    %99 = vector.broadcast %cst_55 : f32 to vector<1x128xf32>
    %100 = arith.mulf %98, %99 : vector<1x128xf32>
    %101 = vector.broadcast %100 : vector<1x128xf32> to vector<32x128xf32>
    %102 = arith.subf %93, %101 : vector<32x128xf32>
    %103 = arith.mulf %102, %102 : vector<32x128xf32>
    %cst_56 = arith.constant dense<0.000000e+00> : vector<32x128xf32>
    %104 = tpu.matmul %103, %21, %cst_56 {dimension_numbers = #tpu.dot_dimension_numbers<[1], [0], [0], [1], [0, 0, 1, 1], [], []>} : vector<32x128xf32>, vector<128x128xf32>, vector<32x128xf32> -> vector<32x128xf32>
    %cst_57 = arith.constant dense<0.000000e+00> : vector<128xf32>
    %105 = vector.multi_reduction <add>, %104, %cst_57 [0] : vector<32x128xf32> to vector<128xf32>
    %106 = vector.shape_cast %105 : vector<128xf32> to vector<1x128xf32>
    %cst_58 = arith.constant 0.001953125 : f32
    %107 = vector.broadcast %cst_58 : f32 to vector<1x128xf32>
    %108 = arith.mulf %106, %107 : vector<1x128xf32>
    %cst_59 = arith.constant 9.99999974E-6 : f32
    %109 = vector.broadcast %cst_59 : f32 to vector<1x128xf32>
    %110 = arith.addf %108, %109 : vector<1x128xf32>
    %111 = math.rsqrt %110 : vector<1x128xf32>
    %112 = arith.mulf %94, %111 : vector<1x128xf32>
    %113 = vector.broadcast %112 : vector<1x128xf32> to vector<32x128xf32>
    %114 = arith.mulf %102, %113 : vector<32x128xf32>
    %115 = vector.broadcast %95 : vector<1x128xf32> to vector<32x128xf32>
    %116 = arith.addf %114, %115 : vector<32x128xf32>
    %cst_60 = arith.constant 0.000000e+00 : f32
    %117 = vector.broadcast %cst_60 : f32 to vector<32x128xf32>
    %118 = arith.maximumf %116, %117 : vector<32x128xf32>
    %c0_61 = arith.constant 0 : index
    %c0_62 = arith.constant 0 : index
    %119 = vector.load %arg8[%c0_61, %c0_62] : memref<32x128xf32, #tpu.memory_space<vmem>>, vector<32x128xf32>
    tpu.vector_store %arg8[%c0_61, %c0_62], %118 {strides = array<i32>} : memref<32x128xf32, #tpu.memory_space<vmem>>, vector<32x128xf32>,
    return
  }
}

</mosaic_0001>

<bundles_post_ra>
// kernel: resblock_forward.1
= control target key start
LH: loop header
LB: loop body
LE: loop exit
PB: predicated region body
PF: predicated region fallthrough
CT: control target
= control target key end

     0   :  { %v29_v5 = vlaneseq  ;;  %vm169_vm3 = vcmask 523264   ;;  %s1394_s1 = inlined_call_operand.vmem [shape: f32[3,64,128], index: 1, kind: input, shape index: {}]   ;;  %s1395_s0 = inlined_call_operand.vmem [shape: f32[32,64], index: 0, kind: input, shape index: {}]   ;;  %s1396_s3 = inlined_call_operand.vmem [shape: f32[128,128], index: 3, kind: input, shape index: {}]   ;;  %s1397_s5 = inlined_call_operand.vmem [shape: f32[1,128], index: 5, kind: input, shape index: {}]   ;;  %s1398_s2 = inlined_call_operand.vmem [shape: f32[3,128,128], index: 2, kind: input, shape index: {}]   ;;  %s1399_s4 = inlined_call_operand.vmem [shape: f32[1,128], index: 4, kind: input, shape index: {}]   ;;  %s1400_s7 = inlined_call_operand.vmem [shape: f32[1,128], index: 7, kind: input, shape index: {}]   ;;  %s1401_s6 = inlined_call_operand.vmem [shape: f32[1,128], index: 6, kind: input, shape index: {}]   ;;  %s1402_s8 = inlined_call_operand.vmem [shape: f32[32,128], index: 8, kind: output, shape index: {}]  }
   0x1   :  { %v738_v0 = vld [vmem:[%s1394_s1 + $0xb8] sm:$0xff]  ;;  %v737_v1 = vld [vmem:[%s1394_s1 + $0xb0] sm:$0xff]  ;;  %v736_v6 = vld [vmem:[%s1394_s1 + $0xa8] sm:$0xff] }
   0x2   :  { %v722_v2 = vld [vmem:[%s1394_s1 + $0x78] sm:$0xff]  ;;  %281 = vmatpush.msra.mxu2 %v738_v0  ;;  %v721_v4 = vld [vmem:[%s1394_s1 + $0x70] sm:$0xff]  ;;  %v720_v8 = vld [vmem:[%s1394_s1 + $0x68] sm:$0xff]  ;;  %v886_v13 = vshrl.u32 %v29_v5, 7 }
   0x3   :  { %190 = vmatpush.msra.mxu0 %v722_v2  ;;  %v159_v3 = vld [vmem:[%s1394_s1 + $0x38] sm:$0xff]  ;;  %v158_v7 = vld [vmem:[%s1394_s1 + $0x30] sm:$0xff]  ;;  %v157_v9 = vld [vmem:[%s1394_s1 + $0x28] sm:$0xff] }
   0x4   :  { %231 = vmatpush.msra.mxu1 %v159_v3  ;;  %282 = vmatpush.msra.mxu2 %v737_v1  ;;  %v735_v10 = vld [vmem:[%s1394_s1 + $0xa0] sm:$0xff]  ;;  %v734_v14 = vld [vmem:[%s1394_s1 + $0x98] sm:$0xff]  ;;  %v905_v18 = vld [vmem:[%s1395_s0 + $0x8] sm:$0xff]  ;;  %v38_v19 = vand.u32 15, %v886_v13  ;;  %vm114_vm0 = vcmp.lt.s32.totalorder %v886_v13, 1  ;;  %vm135_vm1 = vcmp.lt.s32.totalorder %v886_v13, 7 }
   0x5   :  { %191 = vmatpush.msra.mxu0 %v721_v4  ;;  %v719_v11 = vld [vmem:[%s1394_s1 + $0x60] sm:$0xff]  ;;  %v718_v15 = vld [vmem:[%s1394_s1 + $0x58] sm:$0xff]  ;;  %v733_v21 = vld [vmem:[%s1394_s1 + $0x90] sm:$0xff]  ;;  %v132_v26 = vrot.slane %v905_v18, 1  ;;  %v31_v31 = vadd.s32 8, %v886_v13  ;;  %v111_v49 = vrot.slane %v905_v18, 7 }
   0x6   :  { %232 = vmatpush.msra.mxu1 %v158_v7  ;;  %283 = vmatpush.msra.mxu2 %v736_v6  ;;  %v156_v12 = vld [vmem:[%s1394_s1 + $0x20] sm:$0xff]  ;;  %v155_v17 = vld [vmem:[%s1394_s1 + $0x18] sm:$0xff]  ;;  %v717_v22 = vld [vmem:[%s1394_s1 + $0x50] sm:$0xff]  ;;  %vm949_vm2 = vcmp.eq.s32.totalorder %v38_v19, 0  ;;  %v32_v50 = vadd.s32 16, %v886_v13  ;;  %v33_v60 = vadd.s32 24, %v886_v13 }
   0x7   :  { %192 = vmatpush.msra.mxu0 %v720_v8  ;;  %v897_v16 = vld [vmem:[%s1395_s0] sm:$0xff]  ;;  %v918_v23 = vld [vmem:[%s1395_s0 + $0x18] sm:$0xff]  ;;  %v154_v24 = vld [vmem:[%s1394_s1 + $0x10] sm:$0xff]  ;;  %v45_v43 = vand.u32 15, %v31_v31 }
   0x8   :  { %233 = vmatpush.msra.mxu1 %v157_v9  ;;  %284 = vmatpush.msra.mxu2 %v735_v10  ;;  %v110_v20 = vrot.slane %v897_v16, 7  ;;  %v131_v25 = vrot.slane %v897_v16, 1  ;;  %v113_v27 = vrot.slane %v918_v23, 7  ;;  %v930_v28 = vld [vmem:[%s1396_s3 + $0x78] sm:$0xff]  ;;  %v732_v29 = vld [vmem:[%s1394_s1 + $0x88] sm:$0xff]  ;;  %v944_v32 = vld [vmem:[%s1396_s3 + $0x70] sm:$0xff] }
   0x9   :  { %193 = vmatpush.msra.mxu0 %v719_v11  ;;  %v716_v30 = vld [vmem:[%s1394_s1 + $0x48] sm:$0xff]  ;;  %308 = vmatpush.msra.mxu3 %v930_v28  ;;  %v960_v36 = vld [vmem:[%s1395_s0 + $0x10] sm:$0xff]  ;;  %v731_v38 = vld [vmem:[%s1394_s1 + $0x80] sm:$0xff]  ;;  %vm999_vm4 = vcmp.eq.s32.totalorder %v45_v43, 15  ;;  %v52_v55 = vand.u32 15, %v32_v50  ;;  %v134_v58 = vrot.slane %v918_v23, 1 }
   0xa   :  { %234 = vmatpush.msra.mxu1 %v156_v12  ;;  %285 = vmatpush.msra.mxu2 %v734_v14  ;;  %v153_v33 = vld [vmem:[%s1394_s1 + $0x8] sm:$0xff]  ;;  %v118_v35 = vsel %vm114_vm0, %v113_v27, %v110_v20  ;;  %v715_v39 = vld [vmem:[%s1394_s1 + $0x40] sm:$0xff]  ;;  %v138_v40 = vsel %vm135_vm1, %v131_v25, %v132_v26  ;;  %v133_v44 = vrot.slane %v960_v36, 1  ;;  %v997_v46 = vld [vmem:[%s1396_s3 + $0x58] sm:$0xff]  ;;  %v117_v54 = vsel %vm114_vm0, %v110_v20, %v111_v49 }
   0xb   :  { %194 = vmatpush.msra.mxu0 %v718_v15  ;;  %v965_v37 = vld [vmem:[%s1396_s3 + $0x68] sm:$0xff]  ;;  %309 = vmatpush.msra.mxu3 %v944_v32  ;;  %v152_v41 = vld [vmem:[%s1394_s1] sm:$0xff]  ;;  %v127_v42 = vsel %vm949_vm2, 0.0, %v118_v35  ;;  %v1012_v51 = vld [vmem:[%s1396_s3 + $0x50] sm:$0xff]  ;;  %v112_v56 = vrot.slane %v960_v36, 7  ;;  %vm1047_vm5 = vcmp.eq.s32.totalorder %v52_v55, 0  ;;  %v139_v7 = vsel %vm135_vm1, %v134_v58, %v131_v25 }
   0xc   :  { %235 = vmatpush.msra.mxu1 %v155_v17  ;;  %286 = vmatpush.msra.mxu2 %v733_v21  ;;  %v988_v45 = vld [vmem:[%s1396_s3 + $0x60] sm:$0xff]  ;;  %v137_v48 = vsel %vm135_vm1, %v132_v26, %v133_v44  ;;  %v1021_v53 = vld [vmem:[%s1396_s3 + $0x48] sm:$0xff]  ;;  %v1042_v59 = vld [vmem:[%s1396_s3 + $0x38] sm:$0xff]  ;;  %v136_v0 = vsel %vm135_vm1, %v133_v44, %v134_v58  ;;  %v59_v3 = vand.u32 15, %v33_v60 }
   0xd   :  { %195 = vmatpush.msra.mxu0 %v717_v22  ;;  %310 = vmatpush.msra.mxu3 %v965_v37  ;;  %v149_v52 = vsel %vm999_vm4, 0.0, %v137_v48  ;;  %v1031_v57 = vld [vmem:[%s1396_s3 + $0x40] sm:$0xff]  ;;  %v116_v62 = vsel %vm114_vm0, %v111_v49, %v112_v56  ;;  %v1056_v63 = vld [vmem:[%s1396_s3 + $0x30] sm:$0xff]  ;;  %v1065_v1 = vld [vmem:[%s1396_s3 + $0x28] sm:$0xff]  ;;  %v115_v9 = vsel %vm114_vm0, %v112_v56, %v113_v27 }
   0xe   :  { %236 = vmatpush.msra.mxu1 %v154_v24  ;;  %287 = vmatpush.msra.mxu2 %v732_v29  ;;  %v129_v2 = vsel %vm1047_vm5, 0.0, %v116_v62  ;;  %v1074_v4 = vld [vmem:[%s1396_s3 + $0x20] sm:$0xff]  ;;  %v1084_v5 = vld [vmem:[%s1396_s3 + $0x18] sm:$0xff]  ;;  %vm1086_vm6 = vcmp.eq.s32.totalorder %v59_v3, 15  ;;  %v1116_v10 = vld [vmem:[%s1396_s3 + $0x10] sm:$0xff] }
   0xf   :  { %196 = vmatpush.msra.mxu0 %v716_v30  ;;  %311 = vmatpush.msra.mxu3 %v988_v45  ;;  %v151_v8 = vsel %vm1086_vm6, 0.0, %v139_v7  ;;  %v1123_v11 = vld [vmem:[%s1396_s3 + $0x8] sm:$0xff]  ;;  %v1130_v12 = vld [vmem:[%s1396_s3] sm:$0xff]  ;;  %vm759_vm10 = vmneg %vm949_vm2 }
  0x10   :  { %237 = vmatpush.msra.mxu1 %v153_v33  ;;  %288 = vmatpush.msra.mxu2 %v731_v38  ;;  %vm779_vm11 = vmneg %vm999_vm4 }
  0x11   :  { %197 = vmatpush.msra.mxu0 %v715_v39  ;;  %739 = vmatmul.msk.f32.vlgmr.msra.gmra.mxu2 %vm169_vm3, %v138_v40  ;;  %vm761_vm12 = vmneg %vm1047_vm5 }
  0x12   :  { %238 = vmatpush.msra.mxu1 %v152_v41  ;;  %723 = vmatmul.msk.f32.vlgmr.msra.gmra.mxu0 %vm169_vm3, %v897_v16  ;;  %vm781_vm13 = vmneg %vm1086_vm6 }
  0x13   :  { %727 = vmatmul.msk.f32.vlgmr.msra.gmra.mxu1 %vm169_vm3, %v127_v42  ;;  %355 = vmatpush.msrb.mxu0 %v930_v28 }
  0x14   :  { %312 = vmatpush.msra.mxu3 %v997_v46 }
  0x15   :  { %356 = vmatpush.msrb.mxu0 %v944_v32 }
  0x16   :  { %313 = vmatpush.msra.mxu3 %v1012_v51 }
  0x17   :  { %357 = vmatpush.msrb.mxu0 %v965_v37 }
  0x18   :  { %314 = vmatpush.msra.mxu3 %v1021_v53 }
  0x19   :  { %740 = vmatmul.msk.f32.gmra.mxu2 %vm169_vm3, %v149_v52  ;;  %358 = vmatpush.msrb.mxu0 %v988_v45 }
  0x1a   :  { %724 = vmatmul.msk.f32.gmra.mxu0 %vm169_vm3, %v905_v18  ;;  %315 = vmatpush.msra.mxu3 %v1031_v57 }
  0x1b   :  { %728 = vmatmul.msk.f32.gmra.mxu1 %vm169_vm3, %v117_v54  ;;  %359 = vmatpush.msrb.mxu0 %v997_v46 }
  0x1c   :  { %316 = vmatpush.msra.mxu3 %v1042_v59 }
  0x1d   :  { %360 = vmatpush.msrb.mxu0 %v1012_v51 }
  0x1e   :  { %317 = vmatpush.msra.mxu3 %v1056_v63 }
  0x1f   :  { %361 = vmatpush.msrb.mxu0 %v1021_v53 }
  0x20   :  { %318 = vmatpush.msra.mxu3 %v1065_v1 }
  0x21   :  { %741 = vmatmul.msk.f32.gmra.mxu2 %vm169_vm3, %v136_v0  ;;  %362 = vmatpush.msrb.mxu0 %v1031_v57 }
  0x22   :  { %725 = vmatmul.msk.f32.gmra.mxu0 %vm169_vm3, %v960_v36  ;;  %319 = vmatpush.msra.mxu3 %v1074_v4 }
  0x23   :  { %729 = vmatmul.msk.f32.gmra.mxu1 %vm169_vm3, %v129_v2  ;;  %363 = vmatpush.msrb.mxu0 %v1042_v59 }
  0x24   :  { %320 = vmatpush.msra.mxu3 %v1084_v5 }
  0x25   :  { %364 = vmatpush.msrb.mxu0 %v1056_v63 }
  0x26   :  { %321 = vmatpush.msra.mxu3 %v1116_v10 }
  0x27   :  { %365 = vmatpush.msrb.mxu0 %v1065_v1 }
  0x28   :  { %322 = vmatpush.msra.mxu3 %v1123_v11 }
  0x29   :  { %742 = vmatmul.msk.f32.gmra.mxu2 %vm169_vm3, %v151_v8  ;;  %366 = vmatpush.msrb.mxu0 %v1074_v4 }
  0x2a   :  { %726 = vmatmul.msk.f32.gmra.mxu0 %vm169_vm3, %v918_v23  ;;  %323 = vmatpush.msra.mxu3 %v1130_v12 }
  0x2b   :  { %730 = vmatmul.msk.f32.gmra.mxu1 %vm169_vm3, %v115_v9  ;;  %367 = vmatpush.msrb.mxu0 %v1084_v5 }
  0x2d   :  { %368 = vmatpush.msrb.mxu0 %v1116_v10 }
  0x2f   :  { %369 = vmatpush.msrb.mxu0 %v1123_v11 }
  0x31   :  { %370 = vmatpush.msrb.mxu0 %v1130_v12 }
  0x33   :  { %591 = vmatpush.msra.mxu0 %v930_v28 }
  0x35   :  { %592 = vmatpush.msra.mxu0 %v944_v32 }
  0x37   :  { %593 = vmatpush.msra.mxu0 %v965_v37 }
  0x39   :  { %594 = vmatpush.msra.mxu0 %v988_v45 }
  0x3b   :  { %595 = vmatpush.msra.mxu0 %v997_v46 }
  0x3d   :  { %596 = vmatpush.msra.mxu0 %v1012_v51 }
  0x3f   :  { %597 = vmatpush.msra.mxu0 %v1021_v53 }
  0x41   :  { %598 = vmatpush.msra.mxu0 %v1031_v57 }
  0x43   :  { %599 = vmatpush.msra.mxu0 %v1042_v59 }
  0x45   :  { %600 = vmatpush.msra.mxu0 %v1056_v63 }
  0x47   :  { %601 = vmatpush.msra.mxu0 %v1065_v1 }
  0x49   :  { %602 = vmatpush.msra.mxu0 %v1074_v4 }
  0x4b   :  { %603 = vmatpush.msra.mxu0 %v1084_v5 }
  0x4d   :  { %604 = vmatpush.msra.mxu0 %v1116_v10 }
  0x4f   :  { %605 = vmatpush.msra.mxu0 %v1123_v11 }
  0x51   :  { %606 = vmatpush.msra.mxu0 %v1130_v12 }
  0x8f   :  { %v199_v14 = vpop.f32.mrf.mxu0 }
  0x90   :  { %v240_v15 = vpop.f32.mrf.mxu1 }
  0x91   :  { %v241_v16 = vadd.f32 %v240_v15, %v199_v14  ;;  %v758_v14 = vld [vmem:[%s1398_s2 + $0xf8] sm:$0xff] }
  0x92   :  { %481 = vmatpush.msrb.mxu1 %v758_v14 }
  0x94   :  { %v290_v17 = vpop.f32.mrf.mxu2 }
  0x95   :  { %v302_v18 = vadd.f32 %v290_v17, %v241_v16  ;;  %v757_v16 = vld [vmem:[%s1398_s2 + $0xf0] sm:$0xff]  ;;  %v463_v17 = vld [vmem:[%s1398_s2 + $0x78] sm:$0xff] }
  0x96   :  { %482 = vmatpush.msrb.mxu1 %v757_v16  ;;  %510 = vmatpush.msrb.mxu2 %v463_v17  ;;  %v768_v16 = vld [vmem:[%s1398_s2 + $0x128] sm:$0xff]  ;;  %v746_v17 = vld [vmem:[%s1398_s2 + $0x98] sm:$0xff] }
  0x97   :  { %324 = vmatmul.f32.vlgmr.msra.gmra.mxu3 %v302_v18  ;;  %v202_v19 = vpop.f32.mrf.mxu0 }
  0x98   :  { %v243_v20 = vpop.f32.mrf.mxu1 }
  0x99   :  { %v244_v21 = vadd.f32 %v243_v20, %v202_v19  ;;  %v756_v19 = vld [vmem:[%s1398_s2 + $0xe8] sm:$0xff]  ;;  %v462_v20 = vld [vmem:[%s1398_s2 + $0x70] sm:$0xff] }
  0x9a   :  { %483 = vmatpush.msrb.mxu1 %v756_v19  ;;  %511 = vmatpush.msrb.mxu2 %v462_v20  ;;  %v767_v19 = vld [vmem:[%s1398_s2 + $0x120] sm:$0xff] }
  0x9c   :  { %v293_v22 = vpop.f32.mrf.mxu2 }
  0x9d   :  { %v303_v23 = vadd.f32 %v293_v22, %v244_v21  ;;  %v777_v21 = vld [vmem:[%s1398_s2 + $0x170] sm:$0xff]  ;;  %v755_v22 = vld [vmem:[%s1398_s2 + $0xe0] sm:$0xff] }
  0x9e   :  { %484 = vmatpush.msrb.mxu1 %v755_v22  ;;  %v451_v22 = vld [vmem:[%s1398_s2 + $0x18] sm:$0xff] }
  0x9f   :  { %327 = vmatmul.f32.gmra.mxu3 %v303_v23  ;;  %v205_v24 = vpop.f32.mrf.mxu0 }
  0xa0   :  { %v246_v25 = vpop.f32.mrf.mxu1 }
  0xa1   :  { %v247_v26 = vadd.f32 %v246_v25, %v205_v24  ;;  %v776_v24 = vld [vmem:[%s1398_s2 + $0x168] sm:$0xff]  ;;  %v754_v25 = vld [vmem:[%s1398_s2 + $0xd8] sm:$0xff] }
  0xa2   :  { %485 = vmatpush.msrb.mxu1 %v754_v25  ;;  %v744_v25 = vld [vmem:[%s1398_s2 + $0x88] sm:$0xff] }
  0xa4   :  { %v296_v27 = vpop.f32.mrf.mxu2 }
  0xa5   :  { %v304_v29 = vadd.f32 %v296_v27, %v247_v26  ;;  %v460_v27 = vld [vmem:[%s1398_s2 + $0x60] sm:$0xff] }
  0xa7   :  { %330 = vmatmul.f32.gmra.mxu3 %v304_v29  ;;  %v208_v30 = vpop.f32.mrf.mxu0 }
  0xa8   :  { %v249_v31 = vpop.f32.mrf.mxu1 }
  0xa9   :  { %v250_v33 = vadd.f32 %v249_v31, %v208_v30  ;;  %v753_v30 = vld [vmem:[%s1398_s2 + $0xd0] sm:$0xff]  ;;  %v459_v31 = vld [vmem:[%s1398_s2 + $0x58] sm:$0xff] }
  0xaa   :  { %486 = vmatpush.msrb.mxu1 %v753_v30  ;;  %v743_v30 = vld [vmem:[%s1398_s2 + $0x80] sm:$0xff] }
  0xac   :  { %v299_v35 = vpop.f32.mrf.mxu2 }
  0xad   :  { %v305_v36 = vadd.f32 %v299_v35, %v250_v33  ;;  %v774_v33 = vld [vmem:[%s1398_s2 + $0x158] sm:$0xff]  ;;  %v752_v35 = vld [vmem:[%s1398_s2 + $0xc8] sm:$0xff] }
  0xae   :  { %487 = vmatpush.msrb.mxu1 %v752_v35  ;;  %v764_v35 = vld [vmem:[%s1398_s2 + $0x108] sm:$0xff] }
  0xaf   :  { %333 = vmatmul.f32.gmra.mxu3 %v305_v36 }
 0x11a   :  { %v325_v38 = vpop.f32.mrf.mxu3 }
 0x122   :  { %v328_v39 = vpop.f32.mrf.mxu3 }
 0x123   :  { %v337_v41 = vadd.f32 %v328_v39, %v325_v38  ;;  %v773_v38 = vld [vmem:[%s1398_s2 + $0x150] sm:$0xff] }
 0x12a   :  { %v331_v40 = vpop.f32.mrf.mxu3 }
 0x12b   :  { %v338_v42 = vadd.f32 %v337_v41, %v331_v40  ;;  %v751_v40 = vld [vmem:[%s1398_s2 + $0xc0] sm:$0xff]  ;;  %v457_v41 = vld [vmem:[%s1398_s2 + $0x48] sm:$0xff] }
 0x12c   :  { %488 = vmatpush.msrb.mxu1 %v751_v40 }
 0x132   :  { %v334_v43 = vpop.f32.mrf.mxu3 }
 0x133   :  { %v339_v44 = vadd.f32 %v338_v42, %v334_v43  ;;  %v772_v42 = vld [vmem:[%s1398_s2 + $0x148] sm:$0xff] }
 0x135   :  { %v340_v48 = vrot.slane %v339_v44, 4 }
 0x137   :  { %v341_v49 = vadd.f32 %v340_v48, %v339_v44  ;;  %v750_v44 = vld [vmem:[%s1398_s2 + $0xb8] sm:$0xff] }
 0x138   :  { %489 = vmatpush.msrb.mxu1 %v750_v44 }
 0x139   :  { %v342_v50 = vrot.slane %v341_v49, 2 }
 0x13b   :  { %v343_v52 = vadd.f32 %v342_v50, %v341_v49  ;;  %v456_v49 = vld [vmem:[%s1398_s2 + $0x40] sm:$0xff] }
 0x13c   :  { %v771_v50 = vld [vmem:[%s1398_s2 + $0x140] sm:$0xff] }
 0x13d   :  { %v344_v54 = vrot.slane %v343_v52, 1 }
 0x13f   :  { %v345_v55 = vadd.f32 %v344_v54, %v343_v52  ;;  %v749_v54 = vld [vmem:[%s1398_s2 + $0xb0] sm:$0xff] }
 0x140   :  { %490 = vmatpush.msrb.mxu1 %v749_v54 }
 0x141   :  { %v346_v56 = vmul.f32 0.001953125, %v345_v55  ;;  %v455_v55 = vld [vmem:[%s1398_s2 + $0x38] sm:$0xff] }
 0x143   :  { %v1150_v58 = vsub.f32 %v302_v18, %v346_v56  ;;  %v1154_v62 = vsub.f32 %v303_v23, %v346_v56  ;;  %v1158_v2 = vsub.f32 %v304_v29, %v346_v56  ;;  %v1162_v7 = vsub.f32 %v305_v36, %v346_v56  ;;  %v778_v18 = vld [vmem:[%s1398_s2 + $0x178] sm:$0xff]  ;;  %v461_v23 = vld [vmem:[%s1398_s2 + $0x68] sm:$0xff]  ;;  %v775_v29 = vld [vmem:[%s1398_s2 + $0x160] sm:$0xff] }
 0x144   :  { %556 = vmatpush.msrb.mxu3 %v778_v18  ;;  %512 = vmatpush.msrb.mxu2 %v461_v23  ;;  %v458_v36 = vld [vmem:[%s1398_s2 + $0x50] sm:$0xff]  ;;  %v770_v56 = vld [vmem:[%s1398_s2 + $0x138] sm:$0xff]  ;;  %v452_v18 = vld [vmem:[%s1398_s2 + $0x20] sm:$0xff] }
 0x145   :  { %v351_v60 = vmul.f32 %v1150_v58, %v1150_v58  ;;  %v352_v0 = vmul.f32 %v1154_v62, %v1154_v62  ;;  %v353_v3 = vmul.f32 %v1158_v2, %v1158_v2  ;;  %v354_v8 = vmul.f32 %v1162_v7, %v1162_v7  ;;  %v766_v23 = vld [vmem:[%s1398_s2 + $0x118] sm:$0xff] }
 0x146   :  { %557 = vmatpush.msrb.mxu3 %v777_v21  ;;  %513 = vmatpush.msrb.mxu2 %v460_v27  ;;  %v745_v21 = vld [vmem:[%s1398_s2 + $0x90] sm:$0xff] }
 0x147   :  { %371 = vmatmul.f32.vlgmr.msrb.gmra.mxu0 %v351_v60  ;;  %v765_v27 = vld [vmem:[%s1398_s2 + $0x110] sm:$0xff] }
 0x148   :  { %558 = vmatpush.msrb.mxu3 %v776_v24  ;;  %514 = vmatpush.msrb.mxu2 %v459_v31  ;;  %v449_v31 = vld [vmem:[%s1398_s2 + $0x8] sm:$0xff] }
 0x14a   :  { %559 = vmatpush.msrb.mxu3 %v775_v29  ;;  %515 = vmatpush.msrb.mxu2 %v458_v36 }
 0x14c   :  { %560 = vmatpush.msrb.mxu3 %v774_v33  ;;  %516 = vmatpush.msrb.mxu2 %v457_v41 }
 0x14e   :  { %561 = vmatpush.msrb.mxu3 %v773_v38  ;;  %517 = vmatpush.msrb.mxu2 %v456_v49  ;;  %v448_v38 = vld [vmem:[%s1398_s2] sm:$0xff] }
 0x14f   :  { %374 = vmatmul.f32.gmra.mxu0 %v352_v0  ;;  %v748_v0 = vld [vmem:[%s1398_s2 + $0xa8] sm:$0xff] }
 0x150   :  { %562 = vmatpush.msrb.mxu3 %v772_v42  ;;  %518 = vmatpush.msrb.mxu2 %v455_v55 }
 0x151   :  { %491 = vmatpush.msrb.mxu1 %v748_v0 }
 0x152   :  { %563 = vmatpush.msrb.mxu3 %v771_v50 }
 0x154   :  { %564 = vmatpush.msrb.mxu3 %v770_v56 }
 0x157   :  { %377 = vmatmul.f32.gmra.mxu0 %v353_v3  ;;  %v454_v3 = vld [vmem:[%s1398_s2 + $0x30] sm:$0xff] }
 0x158   :  { %519 = vmatpush.msrb.mxu2 %v454_v3 }
 0x15f   :  { %380 = vmatmul.f32.gmra.mxu0 %v354_v8  ;;  %v769_v8 = vld [vmem:[%s1398_s2 + $0x130] sm:$0xff] }
 0x160   :  { %565 = vmatpush.msrb.mxu3 %v769_v8 }
 0x162   :  { %566 = vmatpush.msrb.mxu3 %v768_v16 }
 0x164   :  { %567 = vmatpush.msrb.mxu3 %v767_v19 }
 0x166   :  { %568 = vmatpush.msrb.mxu3 %v766_v23 }
 0x168   :  { %569 = vmatpush.msrb.mxu3 %v765_v27 }
 0x16a   :  { %570 = vmatpush.msrb.mxu3 %v764_v35 }
 0x1c4   :  { %v372_v9 = vpop.f32.mrf.mxu0 }
 0x1cc   :  { %v375_v15 = vpop.f32.mrf.mxu0 }
 0x1cd   :  { %v384_v39 = vadd.f32 %v375_v15, %v372_v9  ;;  %v747_v9 = vld [vmem:[%s1398_s2 + $0xa0] sm:$0xff]  ;;  %v453_v15 = vld [vmem:[%s1398_s2 + $0x28] sm:$0xff] }
 0x1ce   :  { %492 = vmatpush.msrb.mxu1 %v747_v9  ;;  %520 = vmatpush.msrb.mxu2 %v453_v15 }
 0x1d0   :  { %493 = vmatpush.msrb.mxu1 %v746_v17  ;;  %521 = vmatpush.msrb.mxu2 %v452_v18 }
 0x1d2   :  { %494 = vmatpush.msrb.mxu1 %v745_v21  ;;  %522 = vmatpush.msrb.mxu2 %v451_v22 }
 0x1d4   :  { %v378_v26 = vpop.f32.mrf.mxu0  ;;  %495 = vmatpush.msrb.mxu1 %v744_v25 }
 0x1d5   :  { %v385_v43 = vadd.f32 %v384_v39, %v378_v26  ;;  %v450_v26 = vld [vmem:[%s1398_s2 + $0x10] sm:$0xff]  ;;  %v763_v39 = vld [vmem:[%s1398_s2 + $0x100] sm:$0xff] }
 0x1d6   :  { %523 = vmatpush.msrb.mxu2 %v450_v26  ;;  %496 = vmatpush.msrb.mxu1 %v743_v30 }
 0x1d7   :  { %571 = vmatpush.msrb.mxu3 %v763_v39 }
 0x1d8   :  { %524 = vmatpush.msrb.mxu2 %v449_v31  ;;  %638 = vmatpush.msra.mxu1 %v930_v28 }
 0x1da   :  { %525 = vmatpush.msrb.mxu2 %v448_v38  ;;  %639 = vmatpush.msra.mxu1 %v944_v32 }
 0x1dc   :  { %v381_v48 = vpop.f32.mrf.mxu0  ;;  %783 = vmatpush.msra.mxu2 %v930_v28  ;;  %640 = vmatpush.msra.mxu1 %v965_v37 }
 0x1dd   :  { %v386_v52 = vadd.f32 %v385_v43, %v381_v48  ;;  %v799_v43 = vld [vmem:[%s1397_s5] ss:$0 sm:$0xff] }
 0x1de   :  { %784 = vmatpush.msra.mxu2 %v944_v32  ;;  %641 = vmatpush.msra.mxu1 %v988_v45 }
 0x1df   :  { %v387_v60 = vrot.slane %v386_v52, 4 }
 0x1e0   :  { %785 = vmatpush.msra.mxu2 %v965_v37  ;;  %642 = vmatpush.msra.mxu1 %v997_v46 }
 0x1e1   :  { %v388_v14 = vadd.f32 %v387_v60, %v386_v52 }
 0x1e2   :  { %786 = vmatpush.msra.mxu2 %v988_v45  ;;  %643 = vmatpush.msra.mxu1 %v1012_v51 }
 0x1e3   :  { %v389_v20 = vrot.slane %v388_v14, 2 }
 0x1e4   :  { %787 = vmatpush.msra.mxu2 %v997_v46  ;;  %644 = vmatpush.msra.mxu1 %v1021_v53  ;;  %v306_v46 = vld [vmem:[%s1399_s4] sm:$0x1] }
 0x1e5   :  { %v390_v24 = vadd.f32 %v389_v20, %v388_v14 }
 0x1e6   :  { %788 = vmatpush.msra.mxu2 %v1012_v51  ;;  %645 = vmatpush.msra.mxu1 %v1031_v57 }
 0x1e7   :  { %v391_v29 = vrot.slane %v390_v24, 1 }
 0x1e8   :  { %789 = vmatpush.msra.mxu2 %v1021_v53  ;;  %646 = vmatpush.msra.mxu1 %v1042_v59 }
 0x1e9   :  { %v392_v33 = vadd.f32 %v391_v29, %v390_v24 }
 0x1ea   :  { %790 = vmatpush.msra.mxu2 %v1031_v57  ;;  %647 = vmatpush.msra.mxu1 %v1056_v63 }
 0x1eb   :  { %v393_v36 = vmul.f32 0.001953125, %v392_v33 }
 0x1ec   :  { %791 = vmatpush.msra.mxu2 %v1042_v59  ;;  %648 = vmatpush.msra.mxu1 %v1065_v1 }
 0x1ed   :  { %v394_v40 = vadd.f32 1e-05, %v393_v36 }
 0x1ee   :  { %792 = vmatpush.msra.mxu2 %v1056_v63  ;;  %649 = vmatpush.msra.mxu1 %v1074_v4 }
 0x1ef   :  { %801 = vrsqrt.f32 %v394_v40  ;;  %vm401_vm8 = vweird.f32 %v394_v40 }
 0x1f0   :  { %793 = vmatpush.msra.mxu2 %v1065_v1  ;;  %650 = vmatpush.msra.mxu1 %v1084_v5 }
 0x1f2   :  { %794 = vmatpush.msra.mxu2 %v1074_v4  ;;  %651 = vmatpush.msra.mxu1 %v1116_v10 }
 0x1f4   :  { %795 = vmatpush.msra.mxu2 %v1084_v5  ;;  %652 = vmatpush.msra.mxu1 %v1123_v11 }
 0x1f5   :  { %v802_v41 = vpop.eup %801 }
 0x1f6   :  { %v396_v42 = vmul.f32 %v802_v41, %v394_v40  ;;  %vm402_vm7 = vweird.f32 %v802_v41  ;;  %796 = vmatpush.msra.mxu2 %v1116_v10  ;;  %653 = vmatpush.msra.mxu1 %v1130_v12 }
 0x1f7   :  { %vm403_vm9 = vmor %vm401_vm8, %vm402_vm7 }
 0x1f8   :  { %v397_v28 = vmul.f32 %v802_v41, %v396_v42  ;;  %797 = vmatpush.msra.mxu2 %v1123_v11 }
 0x1fa   :  { %v398_v32 = vmul.f32 0.5, %v397_v28  ;;  %798 = vmatpush.msra.mxu2 %v1130_v12 }
 0x1fc   :  { %v399_v37 = vsub.f32 1.5, %v398_v32 }
 0x1fe   :  { %v400_v45 = vmul.f32 %v802_v41, %v399_v37 }
 0x200   :  { %v404_v51 = vsel %vm403_vm9, %v802_v41, %v400_v45 }
 0x201   :  { %v405_v53 = vmul.f32 %v404_v51, %v306_v46 }
 0x203   :  { %v407_v57 = vperm.slane %v405_v53, 0 }
 0x205   :  { %v409_v59 = vmul.f32 %v407_v57, %v1150_v58  ;;  %v412_v63 = vmul.f32 %v407_v57, %v1162_v7  ;;  %v410_v44 = vmul.f32 %v407_v57, %v1154_v62  ;;  %v411_v48 = vmul.f32 %v407_v57, %v1158_v2 }
 0x207   :  { %v416_v1 = vadd.f32 %v799_v43, %v409_v59  ;;  %v419_v49 = vadd.f32 %v799_v43, %v412_v63  ;;  %v417_v50 = vadd.f32 %v799_v43, %v410_v44  ;;  %v418_v54 = vadd.f32 %v799_v43, %v411_v48 }
 0x209   :  { %v420_v4 = vmax.f32 %v416_v1, 0.0  ;;  %v423_v52 = vmax.f32 %v419_v49, 0.0  ;;  %v421_v58 = vmax.f32 %v417_v50, 0.0  ;;  %v422_v56 = vmax.f32 %v418_v54, 0.0 }
 0x20b   :  { %497 = vmatmul.f32.vlgmr.msrb.gmra.mxu1 %v420_v4  ;;  %v424_v62 = vrot.slane %v420_v4, 7  ;;  %v427_v5 = vrot.slane %v423_v52, 7  ;;  %v436_v2 = vrot.slane %v420_v4, 1  ;;  %v437_v7 = vrot.slane %v421_v58, 1 }
 0x20c   :  { %v425_v11 = vrot.slane %v421_v58, 7  ;;  %v438_v60 = vrot.slane %v422_v56, 1  ;;  %v426_v0 = vrot.slane %v422_v56, 7  ;;  %v439_v3 = vrot.slane %v423_v52, 1 }
 0x20d   :  { %v431_v10 = vsel %vm114_vm0, %v427_v5, %v424_v62  ;;  %v442_v55 = vsel %vm135_vm1, %v436_v2, %v437_v7 }
 0x20e   :  { %760 = vmatmul.msk.f32.vlgmr.msrb.gmra.mxu2 %vm759_vm10, %v431_v10  ;;  %572 = vmatmul.f32.vlgmr.msrb.gmra.mxu3 %v442_v55  ;;  %v430_v34 = vsel %vm114_vm0, %v424_v62, %v425_v11  ;;  %v441_v12 = vsel %vm135_vm1, %v437_v7, %v438_v60  ;;  %v429_v8 = vsel %vm114_vm0, %v425_v11, %v426_v0 }
 0x20f   :  { %v440_v47 = vsel %vm135_vm1, %v438_v60, %v439_v3  ;;  %v428_v9 = vsel %vm114_vm0, %v426_v0, %v427_v5  ;;  %v443_v14 = vsel %vm135_vm1, %v439_v3, %v436_v2 }
 0x213   :  { %500 = vmatmul.f32.gmra.mxu1 %v421_v58 }
 0x216   :  { %529 = vmatmul.f32.gmra.mxu2 %v430_v34  ;;  %780 = vmatmul.msk.f32.gmra.mxu3 %vm779_vm11, %v441_v12 }
 0x21b   :  { %503 = vmatmul.f32.gmra.mxu1 %v422_v56 }
 0x21e   :  { %762 = vmatmul.msk.f32.gmra.mxu2 %vm761_vm12, %v429_v8  ;;  %578 = vmatmul.f32.gmra.mxu3 %v440_v47 }
 0x223   :  { %506 = vmatmul.f32.gmra.mxu1 %v423_v52 }
 0x226   :  { %535 = vmatmul.f32.gmra.mxu2 %v428_v9  ;;  %782 = vmatmul.msk.f32.gmra.mxu3 %vm781_vm13, %v443_v14  ;;  %v589_v9 = vld [vmem:[%s1401_s6] sm:$0x1] }
 0x288   :  { %v498_v61 = vpop.f32.mrf.mxu1 }
 0x290   :  { %v501_v19 = vpop.f32.mrf.mxu1 }
 0x291   :  { %v527_v15 = vpop.f32.mrf.mxu2  ;;  %v573_v16 = vpop.f32.mrf.mxu3 }
 0x292   :  { %v528_v17 = vadd.f32 %v527_v15, %v498_v61 }
 0x294   :  { %v585_v18 = vadd.f32 %v573_v16, %v528_v17  ;;  %v800_v17 = vld [vmem:[%s1400_s7] ss:$0 sm:$0xff] }
 0x296   :  { %607 = vmatmul.f32.vlgmr.msra.gmra.mxu0 %v585_v18 }
 0x298   :  { %v504_v23 = vpop.f32.mrf.mxu1 }
 0x299   :  { %v530_v20 = vpop.f32.mrf.mxu2  ;;  %v576_v21 = vpop.f32.mrf.mxu3 }
 0x29a   :  { %v531_v22 = vadd.f32 %v530_v20, %v501_v19 }
 0x29c   :  { %v586_v6 = vadd.f32 %v576_v21, %v531_v22 }
 0x29e   :  { %610 = vmatmul.f32.vlgmr.msra.gmra.mxu2 %v586_v6 }
 0x2a0   :  { %v507_v27 = vpop.f32.mrf.mxu1 }
 0x2a1   :  { %v533_v24 = vpop.f32.mrf.mxu2  ;;  %v579_v25 = vpop.f32.mrf.mxu3 }
 0x2a2   :  { %v534_v26 = vadd.f32 %v533_v24, %v504_v23 }
 0x2a4   :  { %v587_v13 = vadd.f32 %v579_v25, %v534_v26 }
 0x2a6   :  { %613 = vmatmul.f32.gmra.mxu2 %v587_v13 }
 0x2a9   :  { %v536_v29 = vpop.f32.mrf.mxu2  ;;  %v582_v31 = vpop.f32.mrf.mxu3 }
 0x2aa   :  { %v537_v30 = vadd.f32 %v536_v29, %v507_v27 }
 0x2ac   :  { %v588_v33 = vadd.f32 %v582_v31, %v537_v30 }
 0x2ae   :  { %616 = vmatmul.f32.gmra.mxu2 %v588_v33 }
 0x313   :  { %v608_v38 = vpop.f32.mrf.mxu0 }
 0x321   :  { %v611_v35 = vpop.f32.mrf.mxu2 }
 0x322   :  { %v620_v39 = vadd.f32 %v611_v35, %v608_v38 }
 0x329   :  { %v614_v36 = vpop.f32.mrf.mxu2 }
 0x32a   :  { %v621_v40 = vadd.f32 %v620_v39, %v614_v36 }
 0x331   :  { %v617_v41 = vpop.f32.mrf.mxu2 }
 0x332   :  { %v622_v42 = vadd.f32 %v621_v40, %v617_v41 }
 0x334   :  { %v623_v28 = vrot.slane %v622_v42, 4 }
 0x336   :  { %v624_v32 = vadd.f32 %v623_v28, %v622_v42 }
 0x338   :  { %v625_v37 = vrot.slane %v624_v32, 2 }
 0x33a   :  { %v626_v45 = vadd.f32 %v625_v37, %v624_v32 }
 0x33c   :  { %v627_v46 = vrot.slane %v626_v45, 1 }
 0x33e   :  { %v628_v51 = vadd.f32 %v627_v46, %v626_v45 }
 0x340   :  { %v629_v53 = vmul.f32 0.001953125, %v628_v51 }
 0x342   :  { %v630_v57 = vsub.f32 %v585_v18, %v629_v53  ;;  %v631_v59 = vsub.f32 %v586_v6, %v629_v53  ;;  %v632_v44 = vsub.f32 %v587_v13, %v629_v53  ;;  %v633_v1 = vsub.f32 %v588_v33, %v629_v53 }
 0x344   :  { %v634_v43 = vmul.f32 %v630_v57, %v630_v57  ;;  %v635_v63 = vmul.f32 %v631_v59, %v631_v59  ;;  %v636_v48 = vmul.f32 %v632_v44, %v632_v44  ;;  %v637_v49 = vmul.f32 %v633_v1, %v633_v1 }
 0x346   :  { %654 = vmatmul.f32.vlgmr.msra.gmra.mxu1 %v634_v43 }
 0x34e   :  { %657 = vmatmul.f32.gmra.mxu1 %v635_v63 }
 0x356   :  { %660 = vmatmul.f32.gmra.mxu1 %v636_v48 }
 0x35e   :  { %663 = vmatmul.f32.gmra.mxu1 %v637_v49 }
 0x3c3   :  { %v655_v50 = vpop.f32.mrf.mxu1 }
 0x3cb   :  { %v658_v4 = vpop.f32.mrf.mxu1 }
 0x3cc   :  { %v667_v58 = vadd.f32 %v658_v4, %v655_v50 }
 0x3d3   :  { %v661_v52 = vpop.f32.mrf.mxu1 }
 0x3d4   :  { %v668_v54 = vadd.f32 %v667_v58, %v661_v52 }
 0x3db   :  { %v664_v62 = vpop.f32.mrf.mxu1 }
 0x3dc   :  { %v669_v5 = vadd.f32 %v668_v54, %v664_v62 }
 0x3de   :  { %v670_v2 = vrot.slane %v669_v5, 4 }
 0x3e0   :  { %v671_v7 = vadd.f32 %v670_v2, %v669_v5 }
 0x3e2   :  { %v672_v10 = vrot.slane %v671_v7, 2 }
 0x3e4   :  { %v673_v55 = vadd.f32 %v672_v10, %v671_v7 }
 0x3e6   :  { %v674_v56 = vrot.slane %v673_v55, 1 }
 0x3e8   :  { %v675_v11 = vadd.f32 %v674_v56, %v673_v55 }
 0x3ea   :  { %v676_v60 = vmul.f32 0.001953125, %v675_v11 }
 0x3ec   :  { %v677_v34 = vadd.f32 1e-05, %v676_v60 }
 0x3ee   :  { %803 = vrsqrt.f32 %v677_v34  ;;  %vm684_vm15 = vweird.f32 %v677_v34 }
 0x3f4   :  { %v804_v12 = vpop.eup %803 }
 0x3f5   :  { %v679_v0 = vmul.f32 %v804_v12, %v677_v34  ;;  %vm685_vm14 = vweird.f32 %v804_v12 }
 0x3f6   :  { %vm686_vm0 = vmor %vm684_vm15, %vm685_vm14 }
 0x3f7   :  { %v680_v3 = vmul.f32 %v804_v12, %v679_v0 }
 0x3f9   :  { %v681_v8 = vmul.f32 0.5, %v680_v3 }
 0x3fb   :  { %v682_v47 = vsub.f32 1.5, %v681_v8 }
 0x3fd   :  { %v683_v14 = vmul.f32 %v804_v12, %v682_v47 }
 0x3ff   :  { %v687_v61 = vsel %vm686_vm0, %v804_v12, %v683_v14 }
 0x400   :  { %v688_v15 = vmul.f32 %v687_v61, %v589_v9 }
 0x402   :  { %v690_v16 = vperm.slane %v688_v15, 0 }
 0x404   :  { %v692_v18 = vmul.f32 %v690_v16, %v630_v57  ;;  %v693_v19 = vmul.f32 %v690_v16, %v631_v59  ;;  %v694_v20 = vmul.f32 %v690_v16, %v632_v44  ;;  %v695_v21 = vmul.f32 %v690_v16, %v633_v1 }
 0x406   :  { %v699_v22 = vadd.f32 %v800_v17, %v692_v18  ;;  %v700_v6 = vadd.f32 %v800_v17, %v693_v19  ;;  %v701_v23 = vadd.f32 %v800_v17, %v694_v20  ;;  %v702_v24 = vadd.f32 %v800_v17, %v695_v21 }
 0x408   :  { %v703_v25 = vmax.f32 %v699_v22, 0.0  ;;  %v704_v26 = vmax.f32 %v700_v6, 0.0  ;;  %v705_v13 = vmax.f32 %v701_v23, 0.0  ;;  %v706_v27 = vmax.f32 %v702_v24, 0.0 }
 0x40a   :  { %707 = vst [vmem:[%s1402_s8] sm:$0xff] %v703_v25 }
 0x40b   :  { %708 = vst [vmem:[%s1402_s8 + $0x8] sm:$0xff] %v704_v26 }
 0x40c   :  { %709 = vst [vmem:[%s1402_s8 + $0x10] sm:$0xff] %v705_v13 }
 0x40d   :  { %710 = vst [vmem:[%s1402_s8 + $0x18] sm:$0xff] %v706_v27 }

</bundles_post_ra>
